<compile_context>
chip_gen: v5e
topology: v5e:2x2
jax: 0.10.0
libtpu: 0.0.40
codegen_flags: <defaults>
</compile_context>

<pallas_src>
import functools

import jax
import jax.numpy as jnp
from jax.experimental import pallas as pl
from jax.experimental.pallas import tpu as pltpu


def _conv3x3_kernel(x_ref, w_ref, m_ref, o_ref, roll_ref, stack_ref, *, W, HW, L, Cin):
    """One (batch, spatial-strip) grid step.

    x_ref:     (1, Cin, HW)      full image, spatial flattened on lanes (resident across strips)
    w_ref:     (Cout, 9*Cin+1)   columns tap-major (k = ky*3+kx), ci minor; last column = bias
    m_ref:     (9, L)            f32 boundary masks for this strip's output columns
    o_ref:     (1, Cout, L)      output strip
    roll_ref:  (Cin, HW)  f32    scratch: rolled full image (reused per tap)
    stack_ref: (9*Cin+1, L) f32  scratch: shifted+masked input stack (im2col-by-roll) + ones row
    """
    lo = pl.multiple_of(pl.program_id(1) * L, 128)   # strip start on the flat spatial axis

    f = x_ref[0].astype(jnp.float32)                 # (Cin, HW)

    for ky in range(3):
        dy = ky - 1
        for kx in range(3):
            dx = kx - 1
            k = ky * 3 + kx
            s = dy * W + dx                          # flat-index shift of this tap
            if s == 0:
                # centre tap: no shift, always in-bounds -> slice the input ref directly.
                stack_ref[k * Cin:(k + 1) * Cin, :] = (
                    x_ref[0, :, pl.ds(lo, L)].astype(jnp.float32))
            else:
                # rolled[:, i] = f[:, (i + s) mod HW]  (XLU lane roll over the full width so
                # the strip slice below sees the true circular image; wraps are masked to 0).
                roll_ref[...] = pltpu.roll(f, (-s) % HW, axis=1)
                strip = roll_ref[:, pl.ds(lo, L)]                        # (Cin, L)
                stack_ref[k * Cin:(k + 1) * Cin, :] = strip * m_ref[k:k + 1, :]

    # Ones row folds the bias (last weight column) into the single MXU contraction.
    stack_ref[9 * Cin:9 * Cin + 1, :] = jnp.ones((1, L), jnp.float32)

    # One MXU push per step, K = 9*Cin + 1.
    acc = jnp.dot(w_ref[...], stack_ref[...], preferred_element_type=jnp.float32)  # (Cout, L)
    o_ref[0] = acc.astype(o_ref.dtype)


def _num_strips(batch, hw, min_steps=4):
    """Smallest strip count giving >= min_steps grid steps with 128-multiple lane strips."""
    best = 1
    for n in range(1, hw // 128 + 1):
        if hw % n == 0 and (hw // n) % 128 == 0:
            best = n
            if batch * n >= min_steps:
                break
    return best


@jax.jit
def key_projection_forward(x_nchw, weight, bias):
    """x_nchw: (B, Cin, H, W); weight: (Cout, Cin, 3, 3); bias: (Cout,) -> (B, Cout, H, W)."""
    B, Cin, H, W = x_nchw.shape
    Cout = weight.shape[0]
    HW = H * W
    assert HW % 128 == 0, "lane-dense design requires H*W to be a multiple of 128"
    # (Cout is ideally a multiple of 8 for fully dense output stores; still correct otherwise.)

    n_strips = _num_strips(B, HW)
    L = HW // n_strips

    # Free, contiguous reshape (no transpose, no pad): spatial onto the 128-wide lane axis.
    x_flat = x_nchw.reshape(B, Cin, HW)

    # Weight re-layout + bias fold: w2[co, k*Cin+ci] = weight[co, ci, ky, kx]; w2[co, -1] = bias.
    w_tap = jnp.transpose(weight, (0, 2, 3, 1)).reshape(Cout, 9 * Cin)
    w2 = jnp.concatenate([w_tap, bias.reshape(Cout, 1)], axis=1).astype(jnp.float32)

    # padding=1 boundary masks, precomputed once (shape-only constants): (9, HW) f32.
    pos = jnp.arange(HW, dtype=jnp.int32)
    yy = pos // W
    xx = pos % W
    rows = []
    for ky in range(3):
        for kx in range(3):
            dy, dx = ky - 1, kx - 1
            rows.append((yy + dy >= 0) & (yy + dy < H) & (xx + dx >= 0) & (xx + dx < W))
    masks = jnp.stack(rows, axis=0).astype(jnp.float32)

    kernel = functools.partial(_conv3x3_kernel, W=W, HW=HW, L=L, Cin=Cin)

    out_flat = pl.pallas_call(
        kernel,
        out_shape=jax.ShapeDtypeStruct((B, Cout, HW), x_nchw.dtype),
        grid_spec=pltpu.PrefetchScalarGridSpec(
            num_scalar_prefetch=0,
            grid=(B, n_strips),
            in_specs=[
                # Full image per batch element, constant block index along the strip axis
                # -> fetched once per b and kept resident while its strips are processed.
                pl.BlockSpec((1, Cin, HW), lambda b, s: (b, 0, 0)),
                pl.BlockSpec((Cout, 9 * Cin + 1), lambda b, s: (0, 0)),
                pl.BlockSpec((9, L), lambda b, s: (0, s)),
            ],
            out_specs=pl.BlockSpec((1, Cout, L), lambda b, s: (b, 0, s)),
            scratch_shapes=[
                pltpu.VMEM((Cin, HW), jnp.float32),
                pltpu.VMEM((9 * Cin + 1, L), jnp.float32),
            ],
        ),
        compiler_params=pltpu.CompilerParams(
            dimension_semantics=("parallel", "parallel"),
            vmem_limit_bytes=32 * 1024 * 1024,
        ),
    )(x_flat, w2, masks)

    # Free contiguous reshape back to NCHW.
    return out_flat.reshape(B, Cout, H, W)


def orthogonal_init(key, out_dim, fan_in, dtype=jnp.float32):
    """Deterministic orthogonal init matching nn.init.orthogonal_ semantics."""
    rows, cols = out_dim, fan_in
    flat_shape = (max(rows, cols), min(rows, cols))
    a = jax.random.normal(key, flat_shape, dtype=jnp.float32)
    q, r = jnp.linalg.qr(a)
    d = jnp.diagonal(r)
    q = q * jnp.where(d == 0, 1.0, jnp.sign(d))
    if rows < cols:
        q = q.T
    return q[:rows, :cols].astype(dtype)


def _conv_ref(x, weight, bias):
    return jax.lax.conv_general_dilated(
        x, weight, window_strides=(1, 1), padding=((1, 1), (1, 1)),
        dimension_numbers=("NCHW", "OIHW", "NCHW"),
    ) + bias[None, :, None, None]


if __name__ == "__main__":
    key = jax.random.PRNGKey(0)
    k_x, k_w, k_b = jax.random.split(key, 3)

    # Small shapes consistent with the module: indim=4, keydim=8, spatial 16x16, batch 2.
    B, Cin, Cout, H, W = 2, 4, 8, 16, 16

    # Parameters as in __init__: orthogonal weight, zero bias.
    w_flat = orthogonal_init(k_w, Cout, Cin * 3 * 3)          # (Cout, Cin*9)
    weight = w_flat.reshape(Cout, Cin, 3, 3)
    bias = jnp.zeros((Cout,), jnp.float32)

    x = jax.random.normal(k_x, (B, Cin, H, W), jnp.float32)   # NCHW like PyTorch

    out = key_projection_forward(x, weight, bias)
    out = jax.block_until_ready(out)
    ref = _conv_ref(x, weight, bias)
    assert out.shape == (B, Cout, H, W)
    assert jnp.allclose(out, ref, atol=1e-4, rtol=1e-4), "mismatch vs reference conv (zero bias)"

    # Also exercise the folded-bias path with a nonzero bias (still deterministic).
    bias2 = jax.random.normal(k_b, (Cout,), jnp.float32)
    out2 = jax.block_until_ready(key_projection_forward(x, weight, bias2))
    ref2 = _conv_ref(x, weight, bias2)
    assert jnp.allclose(out2, ref2, atol=1e-4, rtol=1e-4), "mismatch vs reference conv (nonzero bias)"

    print("KERNEL_OK")
</pallas_src>

<mosaic_0001>
module attributes {stable_mosaic.version = 11 : i64} {
  func.func @_conv3x3_kernel(%arg0: i32, %arg1: i32, %arg2: memref<1x4x256xf32, #tpu.memory_space<vmem>>, %arg3: memref<8x37xf32, #tpu.memory_space<vmem>>, %arg4: memref<9x128xf32, #tpu.memory_space<vmem>>, %arg5: memref<1x8x128xf32, #tpu.memory_space<vmem>>, %arg6: memref<4x256xf32, #tpu.memory_space<vmem>>, %arg7: memref<37x128xf32, #tpu.memory_space<vmem>>) attributes {dimension_semantics = [#tpu.dimension_semantics<parallel>, #tpu.dimension_semantics<parallel>], iteration_bounds = array<i64: 2, 2>, scalar_prefetch = 0 : i64, scratch_operands = 2 : i64, tpu.core_type = #tpu.core_type<tc>, window_params = [{transform_indices = @transform_0, window_bounds = array<i64: 1, 4, 256>}, {pipeline_mode = #tpu.pipeline_mode<synchronous>, transform_indices = @transform_1, window_bounds = array<i64: 8, 37>}, {transform_indices = @transform_2, window_bounds = array<i64: 9, 128>}, {transform_indices = @transform_3, window_bounds = array<i64: 1, 8, 128>}]} {
    %c128_i32 = arith.constant 128 : i32
    %0 = arith.muli %arg1, %c128_i32 : i32
    %1 = tpu.assume_multiple %0, 128 : i32
    %c0 = arith.constant 0 : index
    %c0_0 = arith.constant 0 : index
    %c0_1 = arith.constant 0 : index
    %2 = vector.load %arg2[%c0, %c0_0, %c0_1] : memref<1x4x256xf32, #tpu.memory_space<vmem>>, vector<1x4x256xf32>
    %3 = vector.shape_cast %2 : vector<1x4x256xf32> to vector<4x256xf32>
    %c17_i32 = arith.constant 17 : i32
    %4 = tpu.dynamic_rotate %3 by %c17_i32 dim 1 : vector<4x256xf32>, i32 -> vector<4x256xf32>
    %c0_2 = arith.constant 0 : index
    %c0_3 = arith.constant 0 : index
    %5 = vector.load %arg6[%c0_2, %c0_3] : memref<4x256xf32, #tpu.memory_space<vmem>>, vector<4x256xf32>
    tpu.vector_store %arg6[%c0_2, %c0_3], %4 {strides = array<i32>} : memref<4x256xf32, #tpu.memory_space<vmem>>, vector<4x256xf32>,
    %c0_4 = arith.constant 0 : index
    %6 = arith.index_cast %1 : i32 to index
    %7 = vector.load %arg6[%c0_4, %6] : memref<4x256xf32, #tpu.memory_space<vmem>>, vector<4x128xf32>
    %c0_5 = arith.constant 0 : index
    %c0_6 = arith.constant 0 : index
    %8 = vector.load %arg4[%c0_5, %c0_6] : memref<9x128xf32, #tpu.memory_space<vmem>>, vector<1x128xf32>
    %9 = vector.broadcast %8 : vector<1x128xf32> to vector<4x128xf32>
    %10 = arith.mulf %7, %9 : vector<4x128xf32>
    %c0_7 = arith.constant 0 : index
    %c0_8 = arith.constant 0 : index
    %11 = vector.load %arg7[%c0_7, %c0_8] : memref<37x128xf32, #tpu.memory_space<vmem>>, vector<4x128xf32>
    tpu.vector_store %arg7[%c0_7, %c0_8], %10 {strides = array<i32>} : memref<37x128xf32, #tpu.memory_space<vmem>>, vector<4x128xf32>,
    %c16_i32 = arith.constant 16 : i32
    %12 = tpu.dynamic_rotate %3 by %c16_i32 dim 1 : vector<4x256xf32>, i32 -> vector<4x256xf32>
    %c0_9 = arith.constant 0 : index
    %c0_10 = arith.constant 0 : index
    %13 = vector.load %arg6[%c0_9, %c0_10] : memref<4x256xf32, #tpu.memory_space<vmem>>, vector<4x256xf32>
    tpu.vector_store %arg6[%c0_9, %c0_10], %12 {strides = array<i32>} : memref<4x256xf32, #tpu.memory_space<vmem>>, vector<4x256xf32>,
    %c0_11 = arith.constant 0 : index
    %14 = arith.index_cast %1 : i32 to index
    %15 = vector.load %arg6[%c0_11, %14] : memref<4x256xf32, #tpu.memory_space<vmem>>, vector<4x128xf32>
    %c1 = arith.constant 1 : index
    %c0_12 = arith.constant 0 : index
    %16 = vector.load %arg4[%c1, %c0_12] : memref<9x128xf32, #tpu.memory_space<vmem>>, vector<1x128xf32>
    %17 = vector.broadcast %16 : vector<1x128xf32> to vector<4x128xf32>
    %18 = arith.mulf %15, %17 : vector<4x128xf32>
    %c4 = arith.constant 4 : index
    %c0_13 = arith.constant 0 : index
    %19 = vector.load %arg7[%c4, %c0_13] : memref<37x128xf32, #tpu.memory_space<vmem>>, vector<4x128xf32>
    tpu.vector_store %arg7[%c4, %c0_13], %18 {strides = array<i32>} : memref<37x128xf32, #tpu.memory_space<vmem>>, vector<4x128xf32>,
    %c15_i32 = arith.constant 15 : i32
    %20 = tpu.dynamic_rotate %3 by %c15_i32 dim 1 : vector<4x256xf32>, i32 -> vector<4x256xf32>
    %c0_14 = arith.constant 0 : index
    %c0_15 = arith.constant 0 : index
    %21 = vector.load %arg6[%c0_14, %c0_15] : memref<4x256xf32, #tpu.memory_space<vmem>>, vector<4x256xf32>
    tpu.vector_store %arg6[%c0_14, %c0_15], %20 {strides = array<i32>} : memref<4x256xf32, #tpu.memory_space<vmem>>, vector<4x256xf32>,
    %c0_16 = arith.constant 0 : index
    %22 = arith.index_cast %1 : i32 to index
    %23 = vector.load %arg6[%c0_16, %22] : memref<4x256xf32, #tpu.memory_space<vmem>>, vector<4x128xf32>
    %c2 = arith.constant 2 : index
    %c0_17 = arith.constant 0 : index
    %24 = vector.load %arg4[%c2, %c0_17] : memref<9x128xf32, #tpu.memory_space<vmem>>, vector<1x128xf32>
    %25 = vector.broadcast %24 : vector<1x128xf32> to vector<4x128xf32>
    %26 = arith.mulf %23, %25 : vector<4x128xf32>
    %c8 = arith.constant 8 : index
    %c0_18 = arith.constant 0 : index
    %27 = vector.load %arg7[%c8, %c0_18] : memref<37x128xf32, #tpu.memory_space<vmem>>, vector<4x128xf32>
    tpu.vector_store %arg7[%c8, %c0_18], %26 {strides = array<i32>} : memref<37x128xf32, #tpu.memory_space<vmem>>, vector<4x128xf32>,
    %c1_i32 = arith.constant 1 : i32
    %28 = tpu.dynamic_rotate %3 by %c1_i32 dim 1 : vector<4x256xf32>, i32 -> vector<4x256xf32>
    %c0_19 = arith.constant 0 : index
    %c0_20 = arith.constant 0 : index
    %29 = vector.load %arg6[%c0_19, %c0_20] : memref<4x256xf32, #tpu.memory_space<vmem>>, vector<4x256xf32>
    tpu.vector_store %arg6[%c0_19, %c0_20], %28 {strides = array<i32>} : memref<4x256xf32, #tpu.memory_space<vmem>>, vector<4x256xf32>,
    %c0_21 = arith.constant 0 : index
    %30 = arith.index_cast %1 : i32 to index
    %31 = vector.load %arg6[%c0_21, %30] : memref<4x256xf32, #tpu.memory_space<vmem>>, vector<4x128xf32>
    %c3 = arith.constant 3 : index
    %c0_22 = arith.constant 0 : index
    %32 = vector.load %arg4[%c3, %c0_22] : memref<9x128xf32, #tpu.memory_space<vmem>>, vector<1x128xf32>
    %33 = vector.broadcast %32 : vector<1x128xf32> to vector<4x128xf32>
    %34 = arith.mulf %31, %33 : vector<4x128xf32>
    %c12 = arith.constant 12 : index
    %c0_23 = arith.constant 0 : index
    %35 = vector.load %arg7[%c12, %c0_23] : memref<37x128xf32, #tpu.memory_space<vmem>>, vector<4x128xf32>
    tpu.vector_store %arg7[%c12, %c0_23], %34 {strides = array<i32>} : memref<37x128xf32, #tpu.memory_space<vmem>>, vector<4x128xf32>,
    %c0_24 = arith.constant 0 : index
    %c0_25 = arith.constant 0 : index
    %36 = arith.index_cast %1 : i32 to index
    %37 = vector.load %arg2[%c0_24, %c0_25, %36] : memref<1x4x256xf32, #tpu.memory_space<vmem>>, vector<1x4x128xf32>
    %38 = vector.shape_cast %37 : vector<1x4x128xf32> to vector<4x128xf32>
    %c16 = arith.constant 16 : index
    %c0_26 = arith.constant 0 : index
    %39 = vector.load %arg7[%c16, %c0_26] : memref<37x128xf32, #tpu.memory_space<vmem>>, vector<4x128xf32>
    tpu.vector_store %arg7[%c16, %c0_26], %38 {strides = array<i32>} : memref<37x128xf32, #tpu.memory_space<vmem>>, vector<4x128xf32>,
    %c255_i32 = arith.constant 255 : i32
    %40 = tpu.dynamic_rotate %3 by %c255_i32 dim 1 : vector<4x256xf32>, i32 -> vector<4x256xf32>
    %c0_27 = arith.constant 0 : index
    %c0_28 = arith.constant 0 : index
    %41 = vector.load %arg6[%c0_27, %c0_28] : memref<4x256xf32, #tpu.memory_space<vmem>>, vector<4x256xf32>
    tpu.vector_store %arg6[%c0_27, %c0_28], %40 {strides = array<i32>} : memref<4x256xf32, #tpu.memory_space<vmem>>, vector<4x256xf32>,
    %c0_29 = arith.constant 0 : index
    %42 = arith.index_cast %1 : i32 to index
    %43 = vector.load %arg6[%c0_29, %42] : memref<4x256xf32, #tpu.memory_space<vmem>>, vector<4x128xf32>
    %c5 = arith.constant 5 : index
    %c0_30 = arith.constant 0 : index
    %44 = vector.load %arg4[%c5, %c0_30] : memref<9x128xf32, #tpu.memory_space<vmem>>, vector<1x128xf32>
    %45 = vector.broadcast %44 : vector<1x128xf32> to vector<4x128xf32>
    %46 = arith.mulf %43, %45 : vector<4x128xf32>
    %c20 = arith.constant 20 : index
    %c0_31 = arith.constant 0 : index
    %47 = vector.load %arg7[%c20, %c0_31] : memref<37x128xf32, #tpu.memory_space<vmem>>, vector<4x128xf32>
    tpu.vector_store %arg7[%c20, %c0_31], %46 {strides = array<i32>} : memref<37x128xf32, #tpu.memory_space<vmem>>, vector<4x128xf32>,
    %c241_i32 = arith.constant 241 : i32
    %48 = tpu.dynamic_rotate %3 by %c241_i32 dim 1 : vector<4x256xf32>, i32 -> vector<4x256xf32>
    %c0_32 = arith.constant 0 : index
    %c0_33 = arith.constant 0 : index
    %49 = vector.load %arg6[%c0_32, %c0_33] : memref<4x256xf32, #tpu.memory_space<vmem>>, vector<4x256xf32>
    tpu.vector_store %arg6[%c0_32, %c0_33], %48 {strides = array<i32>} : memref<4x256xf32, #tpu.memory_space<vmem>>, vector<4x256xf32>,
    %c0_34 = arith.constant 0 : index
    %50 = arith.index_cast %1 : i32 to index
    %51 = vector.load %arg6[%c0_34, %50] : memref<4x256xf32, #tpu.memory_space<vmem>>, vector<4x128xf32>
    %c6 = arith.constant 6 : index
    %c0_35 = arith.constant 0 : index
    %52 = vector.load %arg4[%c6, %c0_35] : memref<9x128xf32, #tpu.memory_space<vmem>>, vector<1x128xf32>
    %53 = vector.broadcast %52 : vector<1x128xf32> to vector<4x128xf32>
    %54 = arith.mulf %51, %53 : vector<4x128xf32>
    %c24 = arith.constant 24 : index
    %c0_36 = arith.constant 0 : index
    %55 = vector.load %arg7[%c24, %c0_36] : memref<37x128xf32, #tpu.memory_space<vmem>>, vector<4x128xf32>
    tpu.vector_store %arg7[%c24, %c0_36], %54 {strides = array<i32>} : memref<37x128xf32, #tpu.memory_space<vmem>>, vector<4x128xf32>,
    %c240_i32 = arith.constant 240 : i32
    %56 = tpu.dynamic_rotate %3 by %c240_i32 dim 1 : vector<4x256xf32>, i32 -> vector<4x256xf32>
    %c0_37 = arith.constant 0 : index
    %c0_38 = arith.constant 0 : index
    %57 = vector.load %arg6[%c0_37, %c0_38] : memref<4x256xf32, #tpu.memory_space<vmem>>, vector<4x256xf32>
    tpu.vector_store %arg6[%c0_37, %c0_38], %56 {strides = array<i32>} : memref<4x256xf32, #tpu.memory_space<vmem>>, vector<4x256xf32>,
    %c0_39 = arith.constant 0 : index
    %58 = arith.index_cast %1 : i32 to index
    %59 = vector.load %arg6[%c0_39, %58] : memref<4x256xf32, #tpu.memory_space<vmem>>, vector<4x128xf32>
    %c7 = arith.constant 7 : index
    %c0_40 = arith.constant 0 : index
    %60 = vector.load %arg4[%c7, %c0_40] : memref<9x128xf32, #tpu.memory_space<vmem>>, vector<1x128xf32>
    %61 = vector.broadcast %60 : vector<1x128xf32> to vector<4x128xf32>
    %62 = arith.mulf %59, %61 : vector<4x128xf32>
    %c28 = arith.constant 28 : index
    %c0_41 = arith.constant 0 : index
    %63 = vector.load %arg7[%c28, %c0_41] : memref<37x128xf32, #tpu.memory_space<vmem>>, vector<4x128xf32>
    tpu.vector_store %arg7[%c28, %c0_41], %62 {strides = array<i32>} : memref<37x128xf32, #tpu.memory_space<vmem>>, vector<4x128xf32>,
    %c239_i32 = arith.constant 239 : i32
    %64 = tpu.dynamic_rotate %3 by %c239_i32 dim 1 : vector<4x256xf32>, i32 -> vector<4x256xf32>
    %c0_42 = arith.constant 0 : index
    %c0_43 = arith.constant 0 : index
    %65 = vector.load %arg6[%c0_42, %c0_43] : memref<4x256xf32, #tpu.memory_space<vmem>>, vector<4x256xf32>
    tpu.vector_store %arg6[%c0_42, %c0_43], %64 {strides = array<i32>} : memref<4x256xf32, #tpu.memory_space<vmem>>, vector<4x256xf32>,
    %c0_44 = arith.constant 0 : index
    %66 = arith.index_cast %1 : i32 to index
    %67 = vector.load %arg6[%c0_44, %66] : memref<4x256xf32, #tpu.memory_space<vmem>>, vector<4x128xf32>
    %c8_45 = arith.constant 8 : index
    %c0_46 = arith.constant 0 : index
    %68 = vector.load %arg4[%c8_45, %c0_46] : memref<9x128xf32, #tpu.memory_space<vmem>>, vector<1x128xf32>
    %69 = vector.broadcast %68 : vector<1x128xf32> to vector<4x128xf32>
    %70 = arith.mulf %67, %69 : vector<4x128xf32>
    %c32 = arith.constant 32 : index
    %c0_47 = arith.constant 0 : index
    %71 = vector.load %arg7[%c32, %c0_47] : memref<37x128xf32, #tpu.memory_space<vmem>>, vector<4x128xf32>
    tpu.vector_store %arg7[%c32, %c0_47], %70 {strides = array<i32>} : memref<37x128xf32, #tpu.memory_space<vmem>>, vector<4x128xf32>,
    %cst = arith.constant 1.000000e+00 : f32
    %72 = vector.broadcast %cst : f32 to vector<1x128xf32>
    %c36 = arith.constant 36 : index
    %c0_48 = arith.constant 0 : index
    %73 = vector.load %arg7[%c36, %c0_48] : memref<37x128xf32, #tpu.memory_space<vmem>>, vector<1x128xf32>
    tpu.vector_store %arg7[%c36, %c0_48], %72 {strides = array<i32>} : memref<37x128xf32, #tpu.memory_space<vmem>>, vector<1x128xf32>,
    %c0_49 = arith.constant 0 : index
    %c0_50 = arith.constant 0 : index
    %74 = vector.load %arg3[%c0_49, %c0_50] : memref<8x37xf32, #tpu.memory_space<vmem>>, vector<8x37xf32>
    %c0_51 = arith.constant 0 : index
    %c0_52 = arith.constant 0 : index
    %75 = vector.load %arg7[%c0_51, %c0_52] : memref<37x128xf32, #tpu.memory_space<vmem>>, vector<37x128xf32>
    %cst_53 = arith.constant dense<0.000000e+00> : vector<8x128xf32>
    %76 = tpu.matmul %74, %75, %cst_53 {dimension_numbers = #tpu.dot_dimension_numbers<[1], [0], [0], [1], [0, 0, 1, 1], [], []>} : vector<8x37xf32>, vector<37x128xf32>, vector<8x128xf32> -> vector<8x128xf32>
    %c0_54 = arith.constant 0 : index
    %c0_55 = arith.constant 0 : index
    %c0_56 = arith.constant 0 : index
    %77 = vector.load %arg5[%c0_54, %c0_55, %c0_56] : memref<1x8x128xf32, #tpu.memory_space<vmem>>, vector<1x8x128xf32>
    %78 = vector.shape_cast %77 : vector<1x8x128xf32> to vector<8x128xf32>
    %79 = vector.shape_cast %76 : vector<8x128xf32> to vector<1x8x128xf32>
    tpu.vector_store %arg5[%c0_54, %c0_55, %c0_56], %79 {strides = array<i32>} : memref<1x8x128xf32, #tpu.memory_space<vmem>>, vector<1x8x128xf32>,
    return
  }
  func.func @transform_0(%arg0: i32, %arg1: i32) -> (i32, i32, i32) {
    %c0_i32 = arith.constant 0 : i32
    %c0_i32_0 = arith.constant 0 : i32
    %c0_i32_1 = arith.constant 0 : i32
    return %arg0, %c0_i32, %c0_i32_0 : i32, i32, i32
  }
  func.func @transform_1(%arg0: i32, %arg1: i32) -> (i32, i32) {
    %c0_i32 = arith.constant 0 : i32
    %c0_i32_0 = arith.constant 0 : i32
    %c0_i32_1 = arith.constant 0 : i32
    return %c0_i32, %c0_i32_0 : i32, i32
  }
  func.func @transform_2(%arg0: i32, %arg1: i32) -> (i32, i32) {
    %c0_i32 = arith.constant 0 : i32
    %c0_i32_0 = arith.constant 0 : i32
    return %c0_i32, %arg1 : i32, i32
  }
  func.func @transform_3(%arg0: i32, %arg1: i32) -> (i32, i32, i32) {
    %c0_i32 = arith.constant 0 : i32
    %c0_i32_0 = arith.constant 0 : i32
    return %arg0, %c0_i32, %arg1 : i32, i32, i32
  }
}

</mosaic_0001>

<bundles_post_ra>
// kernel: key_projection_forward.1
= control target key start
LH: loop header
LB: loop body
LE: loop exit
PB: predicated region body
PF: predicated region fallthrough
CT: control target
= control target key end

     0   :  { %s764_s12 = smov 0   ;;  %s766_s13 = smov 0   ;;  %s909_s0 = inlined_call_operand.vmem [shape: f32[2,4,256], index: 0, kind: input, shape index: {}]   ;;  %s910_s1 = inlined_call_operand.vmem [shape: f32[8,37], index: 1, kind: input, shape index: {}]   ;;  %s911_s2 = inlined_call_operand.vmem [shape: f32[9,256], index: 2, kind: input, shape index: {}]   ;;  %s912_s3 = inlined_call_operand.vmem [shape: f32[2,8,256], index: 3, kind: output, shape index: {}]  }
   0x1   :  { %s768_s14 = smov 0   ;;  %s770_s15 = smov 0  }
   0x2   :  { %s772_s16 = smov 0   ;;  %s774_s17 = smov 0  }
   0x3   :  { %s776_s18 = smov 0  }
   0x4 LB: > { %s22_s19 = sadd.s32 1, %s725_s16  ;;  %s25_s20 = sadd.s32 1, %s729_s17  ;;  %s733_s18 = sphi %s776_s18, %s13_s18   ;;  %s729_s17 = sphi %s774_s17, %s918_s17   ;;  %s725_s16 = sphi %s772_s16, %s917_s16   ;;  %s721_s15 = sphi %s770_s15, %s916_s15   ;;  %s717_s14 = sphi %s768_s14, %s915_s14   ;;  %s713_s13 = sphi %s766_s13, %s914_s13   ;;  %s709_s12 = sphi %s764_s12, %s913_s12  }
   0x5   : > { %p23_p0 = scmp.ge.s32.totalorder %s22_s19, 2  ;;  %s79_s21 = sadd.s32 1, %s713_s13 }
   0x6   : > { %p86_p1 = scmp.ne.s32.totalorder %s713_s13, %s709_s12  ;;  %p87_p2 = scmp.eq.s32.totalorder %s733_s18, 0 }
   0x7   : > { %s920_s19 = smov (%p23_p0, %s22_s19), 0  ;;  %s922_s20 = smov (!%p23_p0, %s25_s20), %s729_s17 }
   0x8   : > { %s76_s22 = ssub.s32 %s725_s16, %s920_s19  ;;  %p88_p3 = por %p87_p2, %p86_p1 }
   0x9   : > { %p27_p4 = scmp.ge.s32.totalorder %s922_s20, 2  ;;  %p77_p5 = scmp.eq.s32.totalorder %s76_s22, 0 }
   0xa   : > { %p589_p6 = scmp.ge.s32.totalorder %s733_s18, 4 }
   0xb   : > { %s924_s20 = smov (%p27_p4, %s922_s20), 0 }
   0xc   : > { %s813_s23 = scalar_select %p77_p5, %s713_s13, %s79_s21  }
   0xd   : > { %143 = sbr.rel (%p589_p6) target bundleno = 24 (0x18), region = 20 }
  0x12   : > { %154 = sbr.rel (!%p88_p3) target bundleno = 24 (0x18), region = 28  ;;  %s156_s24 = sand.u32 (%p88_p3), 1, %s713_s13  }
  0x13   : > { %s591_s25 = sshll.u32 (%p88_p3), %s725_s16, 3  ;;  %s590_s26 = sshll.u32 (%p88_p3), %s156_s24, 4 }
  0x14   : > { %s160_s29 = scalar_lea.vmem (%p88_p3), %s911_s2, %s591_s25  ;;  %s158_s30 = scalar_lea.vmem (%p88_p3), [#allocation4], %s590_s26 }
  0x15   : > { %v191_v0 = vld [vmem:[%s160_s29] sm:$0xff] (%p88_p3)  ;;  %v193_v1 = vld [vmem:[%s160_s29 + $0x10] sm:$0xff] (%p88_p3) }
  0x16   : > { %192 = vst [vmem:[%s158_s30] sm:$0xff] (%p88_p3), %v191_v0 }
  0x17   : > { %194 = vst [vmem:[%s158_s30 + $0x8] sm:$0xff] %v193_v1 }
  0x18 PF: > { %p592_p7 = scmp.ge.s32.totalorder %s733_s18, 1  ;;  %p199_p8 = scmp.lt.s32.totalorder %s733_s18, 5 }
  0x1a   : > { %p200_p9 = pnand %p592_p7, %p199_p8 }
  0x1b   : > { %p237_p10 = scmp.lt.s32.totalorder (!%p200_p9), %s721_s15, 1  ;;  %s735_s8 = smov (!%p200_p9), 17  }
  0x1c   : > { %203 = sbr.rel (%p200_p9) target bundleno = 382 (0x17e), region = 66  ;;  %s206_s9 = sand.u32 (!%p200_p9), 1, %s709_s12  }
  0x1d   : > { %s593_s10 = sshll.u32 (!%p200_p9), %s206_s9, 4  ;;  %s736_s21 = smov (!%p200_p9), 16  }
  0x1e   : > { %s835_s11 = scalar_lea.vmem (!%p200_p9), [#allocation4], %s593_s10  ;;  %s737_s22 = smov (!%p200_p9), 15  }
  0x1f   : > { %s738_s24 = smov (!%p200_p9), 1   ;;  %s739_s12 = smov (!%p200_p9), 127  }
  0x20   : > { %s740_s25 = smov (!%p200_p9), 113   ;;  %s741_s26 = smov (!%p200_p9), 112  }
  0x21   : > { %s926_s15 = smov (!%p237_p10, %s721_s15), 1  ;;  %s742_s27 = smov 111   ;;  %v262_v19 = vlaneseq  ;;  %vm270_vm1 = vcmask 1043456   ;;  %v677_v31 = vld [vmem:[%s835_s11] ss:$0 sm:$0xff]  ;;  %vm459_vm9 = vcmask 1044480  }
  0x22   : > { %s605_s4 = sshll.u32 %s926_s15, 3  ;;  %s598_s28 = sshll.u32 %s717_s14, 7  ;;  %v678_v43 = vld [vmem:[%s835_s11 + $0x1] ss:$0 sm:$0xff]  ;;  %v671_v51 = vld [vmem:[%s835_s11 + $0x2] ss:$0 sm:$0xff] }
  0x23   : > { %s831_s7 = scalar_lea.vmem %s909_s0, %s605_s4  ;;  %v837_v21 = vand.u32 127, %v262_v19  ;;  %s274_s29 = sshra.s32 %s598_s28, 7  ;;  %v672_v60 = vld [vmem:[%s835_s11 + $0x3] ss:$0 sm:$0xff]  ;;  %vm455_vm10 = vcmask 302080  }
  0x24   : > { %v251_v2 = vld [vmem:[%s831_s7] sm:$0xff]  ;;  %s599_s30 = sshll.u32 %s274_s29, 2  ;;  %p244_p11 = scmp.lt.s32.totalorder %s717_s14, 1 }
  0x25   : > { %253 = vst [vmem:[#allocation1] ss:$2 sm:$0xff] %v251_v2  ;;  %vm264_vm0 = vcmp.lt.s32.totalorder %v837_v21, 17  ;;  %vm292_vm2 = vcmp.lt.s32.totalorder %v837_v21, 16  ;;  %vm315_vm3 = vcmp.lt.s32.totalorder %v837_v21, 15  ;;  %s353_s4 = scalar_lea.vmem %s831_s7, %s599_s30  ;;  %s846_s5 = scalar_lea.vmem [#allocation2], %s599_s30 }
  0x26   : > { %v354_v39 = vld [vmem:[%s353_s4] sm:$0xf]  ;;  %vm338_vm4 = vcmp.lt.s32.totalorder %v837_v21, 1  ;;  %vm365_vm5 = vcmp.lt.s32.totalorder %v837_v21, 127  ;;  %vm388_vm6 = vcmp.lt.s32.totalorder %v837_v21, 113  ;;  %vm411_vm7 = vcmp.lt.s32.totalorder %v837_v21, 112 }
  0x27   : > { %355 = vst [vmem:[#allocation3 + $0x10] sm:$0xf] %v354_v39  ;;  %vm434_vm8 = vcmp.lt.s32.totalorder %v837_v21, 111  ;;  %v674_v21 = vld [vmem:[%s835_s11 + $0x8] ss:$0 sm:$0xff]  ;;  %s928_s14 = smov (!%p244_p11, %s717_s14), 1 }
  0x2c   : > { %v254_v3 = vld.sshfl [vmem:[#allocation1] sm:$0xff pattern:$0x75316420]  ;;  %v255_v4 = vld.sshfl [vmem:[#allocation1 + $0x8] sm:$0xff pattern:$0x75316420] }
  0x2d   : > { %258 = vrot.lane.b32.xlu0 %v254_v3, %s735_s8  ;;  %283 = vst [vmem:[#allocation1] ss:$2 sm:$0xff] %v251_v2 }
  0x34   : > { %v284_v5 = vld.sshfl [vmem:[#allocation1] sm:$0xff pattern:$0x75316420]  ;;  %v285_v6 = vld.sshfl [vmem:[#allocation1 + $0x8] sm:$0xff pattern:$0x75316420] }
  0x35   : > { %260 = vrot.lane.b32.xlu0 %v255_v4, %s735_s8  ;;  %288 = vrot.lane.b32.xlu1 %v284_v5, %s736_s21  ;;  %306 = vst [vmem:[#allocation1] ss:$2 sm:$0xff] %v251_v2  ;;  %v743_v5 = vmov 1.0   ;;  %s596_s8 = sshll.u32 %s926_s15, 1 }
  0x36   : > { %448 = vst [vmem:[#allocation3 + $0x24] sm:$0x1] %v743_v5  ;;  %s247_s9 = sadd.s32 %s596_s8, %s928_s14 }
  0x37   : > { %s597_s10 = sshll.u32 %s247_s9, 3 }
  0x3c   : > { %v307_v7 = vld.sshfl [vmem:[#allocation1] sm:$0xff pattern:$0x75316420]  ;;  %v308_v8 = vld.sshfl [vmem:[#allocation1 + $0x8] sm:$0xff pattern:$0x75316420] }
  0x3d   : > { %290 = vrot.lane.b32.xlu1 %v285_v6, %s736_s21  ;;  %311 = vrot.lane.b32.xlu2 %v307_v7, %s737_s22  ;;  %329 = vst [vmem:[#allocation1] ss:$2 sm:$0xff] %v251_v2  ;;  %v673_v6 = vld [vmem:[%s835_s11 + $0x5] ss:$0 sm:$0xff] }
  0x44   : > { %v331_v9 = vld.sshfl [vmem:[#allocation1 + $0x8] sm:$0xff pattern:$0x75316420]  ;;  %v330_v10 = vld.sshfl [vmem:[#allocation1] sm:$0xff pattern:$0x75316420] }
  0x45   : > { %336 = vrot.lane.b32.xlu1 %v331_v9, %s738_s24  ;;  %334 = vrot.lane.b32.xlu0 %v330_v10, %s738_s24  ;;  %356 = vst [vmem:[#allocation1] ss:$2 sm:$0xff] %v251_v2 }
  0x46   : > { %313 = vrot.lane.b32.xlu2 %v308_v8, %s737_s22  ;;  %s249_s22 = scalar_lea.vmem %s912_s3, %s597_s10 }
  0x4c   : > { %v357_v11 = vld.sshfl [vmem:[#allocation1] sm:$0xff pattern:$0x75316420]  ;;  %v358_v12 = vld.sshfl [vmem:[#allocation1 + $0x8] sm:$0xff pattern:$0x75316420] }
  0x4d   : > { %363 = vrot.lane.b32.xlu0 %v358_v12, %s739_s12  ;;  %379 = vst [vmem:[#allocation1] ss:$2 sm:$0xff] %v251_v2 }
  0x4e   : > { %361 = vrot.lane.b32.xlu2 %v357_v11, %s739_s12 }
  0x54   : > { %v380_v13 = vld.sshfl [vmem:[#allocation1] sm:$0xff pattern:$0x75316420]  ;;  %v381_v14 = vld.sshfl [vmem:[#allocation1 + $0x8] sm:$0xff pattern:$0x75316420] }
  0x55   : > { %384 = vrot.lane.b32.xlu1 %v380_v13, %s740_s25  ;;  %402 = vst [vmem:[#allocation1] ss:$2 sm:$0xff] %v251_v2 }
  0x56   : > { %386 = vrot.lane.b32.xlu2 %v381_v14, %s740_s25 }
  0x5c   : > { %v404_v15 = vld.sshfl [vmem:[#allocation1 + $0x8] sm:$0xff pattern:$0x75316420]  ;;  %v403_v16 = vld.sshfl [vmem:[#allocation1] sm:$0xff pattern:$0x75316420] }
  0x5d   : > { %409 = vrot.lane.b32.xlu1 %v404_v15, %s741_s26  ;;  %407 = vrot.lane.b32.xlu0 %v403_v16, %s741_s26  ;;  %425 = vst [vmem:[#allocation1] ss:$2 sm:$0xff] %v251_v2  ;;  %v675_v15 = vld [vmem:[%s835_s11 + $0x6] ss:$0 sm:$0xff] }
  0x64   : > { %v427_v17 = vld.sshfl [vmem:[#allocation1 + $0x8] sm:$0xff pattern:$0x75316420]  ;;  %v426_v18 = vld.sshfl [vmem:[#allocation1] sm:$0xff pattern:$0x75316420] }
  0x65   : > { %432 = vrot.lane.b32.xlu0 %v427_v17, %s742_s27  ;;  %430 = vrot.lane.b32.xlu2 %v426_v18, %s742_s27 }
  0x97   : > { %v312_v22 = vpop.permute.xlu2 %311 }
  0x9f   : > { %v259_v20 = vpop.permute.xlu0 %258 }
  0xa0   : > { %v314_v32 = vpop.permute.xlu2 %313 }
  0xa1   : > { %v316_v37 = vsel %vm315_vm3, %v312_v22, %v314_v32  ;;  %v317_v42 = vsel %vm315_vm3, %v314_v32, %v312_v22 }
  0xa2   : > { %v320_v40 = vrot.slane %v316_v37, 4 }
  0xa4   : > { %v321_v45 = vsel %vm270_vm1, %v317_v42, %v320_v40 }
  0xa7   : > { %v261_v23 = vpop.permute.xlu0 %260  ;;  %v289_v24 = vpop.permute.xlu1 %288 }
  0xa8   : > { %v265_v25 = vsel %vm264_vm0, %v259_v20, %v261_v23  ;;  %v266_v27 = vsel %vm264_vm0, %v261_v23, %v259_v20  ;;  %v362_v50 = vpop.permute.xlu2 %361 }
  0xa9   : > { %v269_v26 = vrot.slane %v265_v25, 4  ;;  %v676_v25 = vld [vmem:[%s835_s11 + $0x7] ss:$0 sm:$0xff] }
  0xab   : > { %v271_v28 = vsel %vm270_vm1, %v266_v27, %v269_v26 }
  0xac   : > { %273 = vst [vmem:[#allocation2] sm:$0xff] %v271_v28 }
  0xaf   : > { %v291_v29 = vpop.permute.xlu1 %290 }
  0xb0   : > { %v293_v30 = vsel %vm292_vm2, %v289_v24, %v291_v29  ;;  %v294_v34 = vsel %vm292_vm2, %v291_v29, %v289_v24  ;;  %v387_v62 = vpop.permute.xlu2 %386 }
  0xb1   : > { %v297_v33 = vrot.slane %v293_v30, 4 }
  0xb3   : > { %v278_v35 = vld [vmem:[%s846_s5] sm:$0xf]  ;;  %v298_v36 = vsel %vm270_vm1, %v294_v34, %v297_v33 }
  0xb4   : > { %300 = vst [vmem:[#allocation2] sm:$0xff] %v298_v36  ;;  %v281_v38 = vmul.f32 %v677_v31, %v278_v35  ;;  %v449_v35 = vld [vmem:[%s910_s1] sm:$0xff] }
  0xb6   : > { %282 = vst [vmem:[#allocation3] sm:$0xf] %v281_v38 }
  0xb7   : > { %v335_v41 = vpop.permute.xlu0 %334  ;;  %v337_v44 = vpop.permute.xlu1 %336 }
  0xb8   : > { %v339_v47 = vsel %vm338_vm4, %v335_v41, %v337_v44  ;;  %v340_v52 = vsel %vm338_vm4, %v337_v44, %v335_v41 }
  0xb9   : > { %v343_v49 = vrot.slane %v339_v47, 4 }
  0xbb   : > { %v301_v46 = vld [vmem:[%s846_s5] sm:$0xf]  ;;  %v344_v55 = vsel %vm270_vm1, %v340_v52, %v343_v49 }
  0xbc   : > { %323 = vst [vmem:[#allocation2] sm:$0xff] %v321_v45  ;;  %v304_v48 = vmul.f32 %v678_v43, %v301_v46 }
  0xbe   : > { %305 = vst [vmem:[#allocation3 + $0x4] sm:$0xf] %v304_v48 }
  0xbf   : > { %v364_v53 = vpop.permute.xlu0 %363  ;;  %v431_v17 = vpop.permute.xlu2 %430 }
  0xc0   : > { %v367_v57 = vsel %vm365_vm5, %v364_v53, %v362_v50  ;;  %v366_v61 = vsel %vm365_vm5, %v362_v50, %v364_v53 }
  0xc1   : > { %v370_v58 = vrot.slane %v367_v57, 4 }
  0xc3   : > { %v324_v54 = vld [vmem:[%s846_s5] sm:$0xf]  ;;  %v371_v0 = vsel %vm270_vm1, %v366_v61, %v370_v58 }
  0xc4   : > { %v327_v56 = vmul.f32 %v671_v51, %v324_v54  ;;  %346 = vst [vmem:[#allocation2] sm:$0xff] %v344_v55 }
  0xc5   : > { %v450_v36 = vld [vmem:[#allocation3] sm:$0xff] }
  0xc6   : > { %328 = vst [vmem:[#allocation3 + $0x8] sm:$0xf] %v327_v56 }
  0xc7   : > { %v385_v59 = vpop.permute.xlu1 %384 }
  0xc8   : > { %v390_v2 = vsel %vm388_vm6, %v387_v62, %v385_v59  ;;  %v389_v7 = vsel %vm388_vm6, %v385_v59, %v387_v62 }
  0xc9   : > { %v393_v3 = vrot.slane %v390_v2, 4 }
  0xcb   : > { %v347_v63 = vld [vmem:[%s846_s5] sm:$0xf]  ;;  %v394_v10 = vsel %vm270_vm1, %v389_v7, %v393_v3 }
  0xcc   : > { %v350_v1 = vmul.f32 %v672_v60, %v347_v63  ;;  %373 = vst [vmem:[#allocation2] sm:$0xff] %v371_v0 }
  0xce   : > { %351 = vst [vmem:[#allocation3 + $0xc] sm:$0xf] %v350_v1 }
  0xcf   : > { %v408_v4 = vpop.permute.xlu0 %407  ;;  %v410_v8 = vpop.permute.xlu1 %409 }
  0xd0   : > { %v413_v12 = vsel %vm411_vm7, %v410_v8, %v408_v4  ;;  %v412_v14 = vsel %vm411_vm7, %v408_v4, %v410_v8 }
  0xd1   : > { %v416_v13 = vrot.slane %v413_v12, 4 }
  0xd3   : > { %v374_v9 = vld [vmem:[%s846_s5] sm:$0xf]  ;;  %v417_v19 = vsel %vm270_vm1, %v412_v14, %v416_v13 }
  0xd4   : > { %v377_v11 = vmul.f32 %v673_v6, %v374_v9  ;;  %396 = vst [vmem:[#allocation2] sm:$0xff] %v394_v10 }
  0xd5   : > { %v451_v34 = vld [vmem:[#allocation3 + $0x8] sm:$0xff] }
  0xd6   : > { %378 = vst [vmem:[#allocation3 + $0x14] sm:$0xf] %v377_v11 }
  0xd7   : > { %v433_v16 = vpop.permute.xlu0 %432 }
  0xd8   : > { %v436_v20 = vsel %vm434_vm8, %v433_v16, %v431_v17  ;;  %v435_v24 = vsel %vm434_vm8, %v431_v17, %v433_v16 }
  0xd9   : > { %v439_v23 = vrot.slane %v436_v20, 4 }
  0xdb   : > { %v397_v18 = vld [vmem:[%s846_s5] sm:$0xf]  ;;  %v440_v27 = vsel %vm270_vm1, %v435_v24, %v439_v23 }
  0xdc   : > { %419 = vst [vmem:[#allocation2] sm:$0xff] %v417_v19  ;;  %v400_v22 = vmul.f32 %v675_v15, %v397_v18 }
  0xdd   : > { %v452_v33 = vld [vmem:[#allocation3 + $0x10] sm:$0xff] }
  0xde   : > { %401 = vst [vmem:[#allocation3 + $0x18] sm:$0xf] %v400_v22 }
  0xe3   : > { %v420_v26 = vld [vmem:[%s846_s5] sm:$0xf] }
  0xe4   : > { %442 = vst [vmem:[#allocation2] sm:$0xff] %v440_v27  ;;  %v423_v28 = vmul.f32 %v676_v25, %v420_v26 }
  0xe6   : > { %424 = vst [vmem:[#allocation3 + $0x1c] sm:$0xf] %v423_v28 }
  0xeb   : > { %v443_v29 = vld [vmem:[%s846_s5] sm:$0xf] }
  0xec   : > { %v446_v30 = vmul.f32 %v674_v21, %v443_v29 }
  0xed   : > { %v453_v32 = vld [vmem:[#allocation3 + $0x18] sm:$0xff] }
  0xee   : > { %447 = vst [vmem:[#allocation3 + $0x20] sm:$0xf] %v446_v30 }
  0xf5   : > { %v454_v31 = vld [vmem:[#allocation3 + $0x20] sm:$0x1f] }
  0xf6   : > { %601 = vmatpush.msk.msra.mxu0 %vm459_vm9, %v454_v31 }
  0xf8   : > { %475 = vmatpush.msra.mxu0 %v453_v32 }
  0xfa   : > { %476 = vmatpush.msra.mxu0 %v452_v33 }
  0xfc   : > { %477 = vmatpush.msra.mxu0 %v451_v34 }
  0xfe   : > { %478 = vmatpush.msra.mxu0 %v450_v36 }
  0xff   : > { %602 = vmatmul.msk.f32.vlgmr.msra.gmra.mxu0 %vm455_vm10, %v449_v35 }
 0x17c   : > { %v480_v37 = vpop.f32.mrf.mxu0 }
 0x17d   : > { %483 = vst [vmem:[%s249_s22] sm:$0xff] %v480_v37 }
 0x17e PF: > { %s13_s18 = sadd.s32 1, %s733_s18   ;;  %s913_s12 = smov %s713_s13 }
 0x17f   : > { %p10_p12 = scmp.ge.s32.totalorder %s13_s18, 6   ;;  %s914_s13 = smov %s813_s23 }
 0x180   : > { %s915_s14 = smov %s725_s16  ;;  %s916_s15 = smov %s729_s17 }
 0x181   : > { %s917_s16 = smov %s920_s19  ;;  %s918_s17 = smov %s924_s20 }
 0x182   :  { %12 = sbr.rel (!%p10_p12) target bundleno = 4 (0x4), region = 110 }

</bundles_post_ra>
